<compile_context>
chip_gen: v7x
topology: tpu7x:2x2x1
jax: 0.10.0
libtpu: 0.0.40
codegen_flags: <defaults>
</compile_context>

<pallas_src>
import functools
import numpy as np

import jax
import jax.numpy as jnp
from jax.experimental import pallas as pl
from jax.experimental.pallas import tpu as pltpu


# ---------------------------------------------------------------------------
# Small helpers
# ---------------------------------------------------------------------------
def _round_up(x: int, m: int) -> int:
    return ((x + m - 1) // m) * m


def _pick(dim: int, pref: int, base: int):
    """Return (padded_dim, tile) with padded_dim % tile == 0 and tile (8,128)-legal."""
    padded = _round_up(dim, base)
    if padded <= pref:
        return padded, padded
    return _round_up(dim, pref), pref


def _pad2d(a, rows: int, cols: int):
    r, c = a.shape
    if r == rows and c == cols:
        return a
    return jnp.pad(a, ((0, rows - r), (0, cols - c)))


def _hw_config():
    """(preferred_tile, vmem_capacity_bytes) for the current TPU generation."""
    try:
        kind = jax.devices()[0].device_kind.lower()
    except Exception:
        kind = ""
    small_gen = any(t in kind for t in ("v2", "v3", "v4", "v5"))
    pref = 512 if small_gen else 1024          # 512-class tiles already MXU-bound on <=v5e
    try:
        vmem_cap = int(pltpu.get_tpu_info().vmem_capacity_bytes)
    except Exception:
        vmem_cap = 64 << 20                    # conservative (v7x per-TC) fallback
    return pref, vmem_cap


def _vmem_bytes(tm, tn, tk, ep, itemsize):
    """Approximate VMEM working set: double-buffered in/out tiles + f32 scratch."""
    io = 2 * itemsize * (tm * tk + 2 * tk * tn + tn * ep + tm * ep)
    scratch = 4 * (2 * tm * tn + tm * ep)
    return io + scratch


# ---------------------------------------------------------------------------
# One-time parameter preparation (call ONCE at load time, not per forward).
#   w_fused: (embed, 2, intermediate)  ->  wg, wu: (Kp, Ip) compute dtype
#   w_o:     (intermediate, embed)     ->  wo:     (Ip, Ep) compute dtype
# ---------------------------------------------------------------------------
def prepare_mlp_params(w_fused, w_o, compute_dtype=jnp.bfloat16):
    E, two, I = w_fused.shape
    assert two == 2 and w_o.shape == (I, E)
    pref, _ = _hw_config()
    Kp, _ = _pick(E, min(pref, 512), 128)      # contraction (embed) padding, tk stays 512-class
    Ip, _ = _pick(I, pref, 128)                # intermediate padding
    Ep = _round_up(E, 128)                     # lane-dense output width
    wg = _pad2d(w_fused[:, 0, :].astype(compute_dtype), Kp, Ip)
    wu = _pad2d(w_fused[:, 1, :].astype(compute_dtype), Kp, Ip)
    wo = _pad2d(w_o.astype(compute_dtype), Ip, Ep)
    return wg, wu, wo


# ---------------------------------------------------------------------------
# Fused kernel:  out[i] = sum_j silu(x_i @ Wg_j) * (x_i @ Wu_j) @ Wo_j
# Grid (i, j, k): i = M tiles (parallel), j = intermediate tiles (reduction for
# the output accumulator), k = embed contraction tiles (reduction).
# ---------------------------------------------------------------------------
def _fused_mlp_kernel(x_ref, wg_ref, wu_ref, wo_ref, o_ref,
                      accg_ref, accu_ref, acco_ref):
    j = pl.program_id(1)
    k = pl.program_id(2)
    nj = pl.num_programs(1)
    nk = pl.num_programs(2)

    @pl.when(jnp.logical_and(j == 0, k == 0))
    def _init_out():
        acco_ref[...] = jnp.zeros_like(acco_ref)

    @pl.when(k == 0)
    def _init_wi():
        accg_ref[...] = jnp.zeros_like(accg_ref)
        accu_ref[...] = jnp.zeros_like(accu_ref)

    a = x_ref[...]                                     # already compute dtype (bf16)
    accg_ref[...] += jnp.dot(a, wg_ref[...], preferred_element_type=jnp.float32)
    accu_ref[...] += jnp.dot(a, wu_ref[...], preferred_element_type=jnp.float32)

    @pl.when(k == nk - 1)
    def _silu_and_project():
        g = accg_ref[...]
        u = accu_ref[...]
        # sigmoid via EUP exp + approx reciprocal (rides EUP slot, free under MXU work)
        sig = pl.reciprocal(1.0 + jnp.exp(-g), approx=True)
        hidden = (g * sig * u).astype(wo_ref.dtype)    # bf16 hidden, matches torch .to(dtype)
        acco_ref[...] += jnp.dot(hidden, wo_ref[...], preferred_element_type=jnp.float32)

    @pl.when(jnp.logical_and(j == nj - 1, k == nk - 1))
    def _store():
        o_ref[...] = acco_ref[...].astype(o_ref.dtype)


# ---------------------------------------------------------------------------
# Forward pass. `wg, wu, wo` come from prepare_mlp_params (already padded/cast).
# ---------------------------------------------------------------------------
def mlp_block_forward(x, wg, wu, wo, *, max_tiles=None):
    batch_shape = x.shape[:-1]
    E = x.shape[-1]
    Kp, Ip = wg.shape
    Ep = wo.shape[1]
    assert wu.shape == (Kp, Ip) and wo.shape == (Ip, Ep)
    assert E <= Kp and E <= Ep
    compute_dtype = wg.dtype
    itemsize = compute_dtype.itemsize

    M = int(np.prod(batch_shape)) if batch_shape else 1
    x2d = x.reshape(M, E).astype(compute_dtype)        # single wrapper-side activation cast

    pref, vmem_cap = _hw_config()
    Mp, tm = _pick(M, pref, 16)                        # base 16: bf16 packs 2 rows/sublane
    _, tn = _pick(Ip, pref, 128)
    _, tk = _pick(Kp, min(pref, 512), 128)
    if max_tiles is not None:                          # testing / manual override
        cm, cn, ck = max_tiles
        tm, tn, tk = min(tm, cm), min(tn, cn), min(tk, ck)

    # Shrink tiles until the double-buffered working set fits the VMEM budget.
    budget = max(vmem_cap - (8 << 20), 16 << 20)
    while _vmem_bytes(tm, tn, tk, Ep, itemsize) > budget:
        if tm >= tn and tm >= 32 and tm % 32 == 0:
            tm //= 2
        elif tn >= 256 and tn % 256 == 0:
            tn //= 2
        elif tk >= 256 and tk % 256 == 0:
            tk //= 2
        elif tm >= 32 and tm % 32 == 0:
            tm //= 2
        else:
            break
    Mp = _round_up(M, tm)
    assert Mp % tm == 0 and Ip % tn == 0 and Kp % tk == 0

    x_p = _pad2d(x2d, Mp, Kp)
    grid = (Mp // tm, Ip // tn, Kp // tk)

    need = _vmem_bytes(tm, tn, tk, Ep, itemsize)
    vmem_limit = int(min(vmem_cap - (2 << 20), max(need + (8 << 20), 32 << 20)))

    cost = pl.CostEstimate(
        flops=6 * M * E * Ip,                          # 2 matmuls (gate/up) + wo projection
        transcendentals=M * Ip,                        # one exp per hidden element
        bytes_accessed=itemsize * (M * E + 2 * Kp * Ip + Ip * Ep + M * Ep),
    )

    out_p = pl.pallas_call(
        _fused_mlp_kernel,
        out_shape=jax.ShapeDtypeStruct((Mp, Ep), compute_dtype),
        grid_spec=pltpu.PrefetchScalarGridSpec(
            num_scalar_prefetch=0,
            grid=grid,
            in_specs=[
                pl.BlockSpec((tm, tk), lambda i, j, k: (i, k)),   # x
                pl.BlockSpec((tk, tn), lambda i, j, k: (k, j)),   # W_gate
                pl.BlockSpec((tk, tn), lambda i, j, k: (k, j)),   # W_up
                pl.BlockSpec((tn, Ep), lambda i, j, k: (j, 0)),   # W_o
            ],
            out_specs=pl.BlockSpec((tm, Ep), lambda i, j, k: (i, 0)),
            scratch_shapes=[
                pltpu.VMEM((tm, tn), jnp.float32),    # gate accumulator
                pltpu.VMEM((tm, tn), jnp.float32),    # up accumulator
                pltpu.VMEM((tm, Ep), jnp.float32),    # output accumulator
            ],
        ),
        compiler_params=pltpu.CompilerParams(
            dimension_semantics=("parallel", "arbitrary", "arbitrary"),
            vmem_limit_bytes=vmem_limit,
        ),
        cost_estimate=cost,
    )(x_p, wg, wu, wo)

    return out_p[:M, :E].reshape(*batch_shape, E)


# ---------------------------------------------------------------------------
# Plain-JAX reference mirroring the torch module's semantics.
# ---------------------------------------------------------------------------
def mlp_ref(x, w_fused, w_o, compute_dtype):
    fused = jnp.tensordot(
        x.astype(compute_dtype), w_fused.astype(compute_dtype),
        axes=((x.ndim - 1,), (0,))
    ).astype(x.dtype)
    gate = fused[..., 0, :]
    up = fused[..., 1, :]
    hidden = (jax.nn.silu(gate) * up).astype(compute_dtype)
    out = jnp.tensordot(hidden, w_o.astype(compute_dtype),
                        axes=((hidden.ndim - 1,), (0,)))
    return out.astype(hidden.dtype)


# ---------------------------------------------------------------------------
# Demo / self-test
# ---------------------------------------------------------------------------
if __name__ == "__main__":
    key = jax.random.PRNGKey(0)
    k_x, k_wf, k_wo = jax.random.split(key, 3)

    B, T = 2, 16
    embed_dim, intermediate_dim = 192, 256
    compute_dtype = jnp.bfloat16

    x = jax.random.normal(k_x, (B, T, embed_dim), dtype=jnp.float32)
    w_fused = (
        jax.random.normal(k_wf, (embed_dim, 2, intermediate_dim), dtype=jnp.float32)
        * 0.05
    ).astype(compute_dtype)
    w_o = (
        jax.random.normal(k_wo, (intermediate_dim, embed_dim), dtype=jnp.float32)
        * 0.05
    ).astype(compute_dtype)

    # One-time weight prep (split / cast / pad hoisted out of the forward pass).
    wg, wu, wo = prepare_mlp_params(w_fused, w_o, compute_dtype)

    ref = mlp_ref(x, w_fused, w_o, compute_dtype)

    # 1) Production config: hardware-preferred tiles (single-block grid at these shapes).
    fwd = jax.jit(mlp_block_forward)
    out = jax.block_until_ready(fwd(x, wg, wu, wo))
    assert out.shape == (B, T, embed_dim), out.shape
    assert out.dtype == compute_dtype, out.dtype
    np.testing.assert_allclose(
        np.asarray(out, dtype=np.float32), np.asarray(ref, dtype=np.float32),
        rtol=2e-2, atol=2e-2,
    )

    # 2) Forced-small tiles: exercises the multi-step (i, j, k) accumulator grid.
    fwd_small = jax.jit(functools.partial(mlp_block_forward, max_tiles=(16, 128, 128)))
    out_small = jax.block_until_ready(fwd_small(x, wg, wu, wo))
    np.testing.assert_allclose(
        np.asarray(out_small, dtype=np.float32), np.asarray(ref, dtype=np.float32),
        rtol=2e-2, atol=2e-2,
    )

    print("KERNEL_OK")
</pallas_src>

<mosaic_0001>
module attributes {stable_mosaic.version = 11 : i64} {
  func.func @_fused_mlp_kernel(%arg0: i32, %arg1: i32, %arg2: i32, %arg3: memref<32x256xbf16, #tpu.memory_space<vmem>>, %arg4: memref<256x256xbf16, #tpu.memory_space<vmem>>, %arg5: memref<256x256xbf16, #tpu.memory_space<vmem>>, %arg6: memref<256x256xbf16, #tpu.memory_space<vmem>>, %arg7: memref<32x256xbf16, #tpu.memory_space<vmem>>, %arg8: memref<32x256xf32, #tpu.memory_space<vmem>>, %arg9: memref<32x256xf32, #tpu.memory_space<vmem>>, %arg10: memref<32x256xf32, #tpu.memory_space<vmem>>) attributes {dimension_semantics = [#tpu.dimension_semantics<parallel>, #tpu.dimension_semantics<arbitrary>, #tpu.dimension_semantics<arbitrary>], iteration_bounds = array<i64: 1, 1, 1>, scalar_prefetch = 0 : i64, scratch_operands = 3 : i64, tpu.core_type = #tpu.core_type<tc>, window_params = [{transform_indices = @transform_0, window_bounds = array<i64: 32, 256>}, {transform_indices = @transform_1, window_bounds = array<i64: 256, 256>}, {transform_indices = @transform_2, window_bounds = array<i64: 256, 256>}, {transform_indices = @transform_3, window_bounds = array<i64: 256, 256>}, {transform_indices = @transform_4, window_bounds = array<i64: 32, 256>}]} {
    %c0_i32 = arith.constant 0 : i32
    %0 = arith.cmpi eq, %arg1, %c0_i32 : i32
    %c0_i32_0 = arith.constant 0 : i32
    %1 = arith.cmpi eq, %arg2, %c0_i32_0 : i32
    %2 = arith.andi %0, %1 : i1
    %3 = arith.extui %2 : i1 to i32
    %c0_i32_1 = arith.constant 0 : i32
    %4 = arith.cmpi ne, %3, %c0_i32_1 : i32
    scf.if %4 {
      %cst_23 = arith.constant 0.000000e+00 : f32
      %27 = vector.broadcast %cst_23 : f32 to vector<32x256xf32>
      %c0_24 = arith.constant 0 : index
      %c0_25 = arith.constant 0 : index
      %28 = vector.load %arg10[%c0_24, %c0_25] : memref<32x256xf32, #tpu.memory_space<vmem>>, vector<32x256xf32>
      tpu.vector_store %arg10[%c0_24, %c0_25], %27 {strides = array<i32>} : memref<32x256xf32, #tpu.memory_space<vmem>>, vector<32x256xf32>,
    } else {
    }
    %c0_i32_2 = arith.constant 0 : i32
    %5 = arith.cmpi eq, %arg2, %c0_i32_2 : i32
    %6 = arith.extui %5 : i1 to i32
    %c0_i32_3 = arith.constant 0 : i32
    %7 = arith.cmpi ne, %6, %c0_i32_3 : i32
    scf.if %7 {
      %cst_23 = arith.constant 0.000000e+00 : f32
      %27 = vector.broadcast %cst_23 : f32 to vector<32x256xf32>
      %c0_24 = arith.constant 0 : index
      %c0_25 = arith.constant 0 : index
      %28 = vector.load %arg8[%c0_24, %c0_25] : memref<32x256xf32, #tpu.memory_space<vmem>>, vector<32x256xf32>
      tpu.vector_store %arg8[%c0_24, %c0_25], %27 {strides = array<i32>} : memref<32x256xf32, #tpu.memory_space<vmem>>, vector<32x256xf32>,
      %cst_26 = arith.constant 0.000000e+00 : f32
      %29 = vector.broadcast %cst_26 : f32 to vector<32x256xf32>
      %c0_27 = arith.constant 0 : index
      %c0_28 = arith.constant 0 : index
      %30 = vector.load %arg9[%c0_27, %c0_28] : memref<32x256xf32, #tpu.memory_space<vmem>>, vector<32x256xf32>
      tpu.vector_store %arg9[%c0_27, %c0_28], %29 {strides = array<i32>} : memref<32x256xf32, #tpu.memory_space<vmem>>, vector<32x256xf32>,
    } else {
    }
    %c0 = arith.constant 0 : index
    %c0_4 = arith.constant 0 : index
    %8 = vector.load %arg3[%c0, %c0_4] : memref<32x256xbf16, #tpu.memory_space<vmem>>, vector<32x256xbf16>
    %c0_5 = arith.constant 0 : index
    %c0_6 = arith.constant 0 : index
    %9 = vector.load %arg8[%c0_5, %c0_6] : memref<32x256xf32, #tpu.memory_space<vmem>>, vector<32x256xf32>
    %c0_7 = arith.constant 0 : index
    %c0_8 = arith.constant 0 : index
    %10 = vector.load %arg4[%c0_7, %c0_8] : memref<256x256xbf16, #tpu.memory_space<vmem>>, vector<256x256xbf16>
    %cst = arith.constant dense<0.000000e+00> : vector<32x256xf32>
    %11 = tpu.matmul %8, %10, %cst {dimension_numbers = #tpu.dot_dimension_numbers<[1], [0], [0], [1], [0, 0, 1, 1], [], []>} : vector<32x256xbf16>, vector<256x256xbf16>, vector<32x256xf32> -> vector<32x256xf32>
    %12 = arith.addf %9, %11 : vector<32x256xf32>
    %c0_9 = arith.constant 0 : index
    %c0_10 = arith.constant 0 : index
    %13 = vector.load %arg8[%c0_9, %c0_10] : memref<32x256xf32, #tpu.memory_space<vmem>>, vector<32x256xf32>
    tpu.vector_store %arg8[%c0_9, %c0_10], %12 {strides = array<i32>} : memref<32x256xf32, #tpu.memory_space<vmem>>, vector<32x256xf32>,
    %c0_11 = arith.constant 0 : index
    %c0_12 = arith.constant 0 : index
    %14 = vector.load %arg9[%c0_11, %c0_12] : memref<32x256xf32, #tpu.memory_space<vmem>>, vector<32x256xf32>
    %c0_13 = arith.constant 0 : index
    %c0_14 = arith.constant 0 : index
    %15 = vector.load %arg5[%c0_13, %c0_14] : memref<256x256xbf16, #tpu.memory_space<vmem>>, vector<256x256xbf16>
    %cst_15 = arith.constant dense<0.000000e+00> : vector<32x256xf32>
    %16 = tpu.matmul %8, %15, %cst_15 {dimension_numbers = #tpu.dot_dimension_numbers<[1], [0], [0], [1], [0, 0, 1, 1], [], []>} : vector<32x256xbf16>, vector<256x256xbf16>, vector<32x256xf32> -> vector<32x256xf32>
    %17 = arith.addf %14, %16 : vector<32x256xf32>
    %c0_16 = arith.constant 0 : index
    %c0_17 = arith.constant 0 : index
    %18 = vector.load %arg9[%c0_16, %c0_17] : memref<32x256xf32, #tpu.memory_space<vmem>>, vector<32x256xf32>
    tpu.vector_store %arg9[%c0_16, %c0_17], %17 {strides = array<i32>} : memref<32x256xf32, #tpu.memory_space<vmem>>, vector<32x256xf32>,
    %c0_i32_18 = arith.constant 0 : i32
    %19 = arith.cmpi eq, %arg2, %c0_i32_18 : i32
    %20 = arith.extui %19 : i1 to i32
    %c0_i32_19 = arith.constant 0 : i32
    %21 = arith.cmpi ne, %20, %c0_i32_19 : i32
    scf.if %21 {
      %c0_23 = arith.constant 0 : index
      %c0_24 = arith.constant 0 : index
      %27 = vector.load %arg8[%c0_23, %c0_24] : memref<32x256xf32, #tpu.memory_space<vmem>>, vector<32x256xf32>
      %c0_25 = arith.constant 0 : index
      %c0_26 = arith.constant 0 : index
      %28 = vector.load %arg9[%c0_25, %c0_26] : memref<32x256xf32, #tpu.memory_space<vmem>>, vector<32x256xf32>
      %cst_27 = arith.constant 0.000000e+00 : f32
      %29 = vector.broadcast %cst_27 : f32 to vector<32x256xf32>
      %30 = arith.subf %29, %27 : vector<32x256xf32>
      %31 = math.exp %30 : vector<32x256xf32>
      %cst_28 = arith.constant 1.000000e+00 : f32
      %32 = vector.broadcast %cst_28 : f32 to vector<32x256xf32>
      %33 = arith.addf %32, %31 : vector<32x256xf32>
      %34 = tpu.reciprocal %33 {approx = true} : vector<32x256xf32> -> vector<32x256xf32>
      %35 = arith.mulf %27, %34 : vector<32x256xf32>
      %36 = arith.mulf %35, %28 : vector<32x256xf32>
      %37 = arith.truncf %36 : vector<32x256xf32> to vector<32x256xbf16>
      %c0_29 = arith.constant 0 : index
      %c0_30 = arith.constant 0 : index
      %38 = vector.load %arg10[%c0_29, %c0_30] : memref<32x256xf32, #tpu.memory_space<vmem>>, vector<32x256xf32>
      %c0_31 = arith.constant 0 : index
      %c0_32 = arith.constant 0 : index
      %39 = vector.load %arg6[%c0_31, %c0_32] : memref<256x256xbf16, #tpu.memory_space<vmem>>, vector<256x256xbf16>
      %cst_33 = arith.constant dense<0.000000e+00> : vector<32x256xf32>
      %40 = tpu.matmul %37, %39, %cst_33 {dimension_numbers = #tpu.dot_dimension_numbers<[1], [0], [0], [1], [0, 0, 1, 1], [], []>} : vector<32x256xbf16>, vector<256x256xbf16>, vector<32x256xf32> -> vector<32x256xf32>
      %41 = arith.addf %38, %40 : vector<32x256xf32>
      %c0_34 = arith.constant 0 : index
      %c0_35 = arith.constant 0 : index
      %42 = vector.load %arg10[%c0_34, %c0_35] : memref<32x256xf32, #tpu.memory_space<vmem>>, vector<32x256xf32>
      tpu.vector_store %arg10[%c0_34, %c0_35], %41 {strides = array<i32>} : memref<32x256xf32, #tpu.memory_space<vmem>>, vector<32x256xf32>,
    } else {
    }
    %c0_i32_20 = arith.constant 0 : i32
    %22 = arith.cmpi eq, %arg1, %c0_i32_20 : i32
    %c0_i32_21 = arith.constant 0 : i32
    %23 = arith.cmpi eq, %arg2, %c0_i32_21 : i32
    %24 = arith.andi %22, %23 : i1
    %25 = arith.extui %24 : i1 to i32
    %c0_i32_22 = arith.constant 0 : i32
    %26 = arith.cmpi ne, %25, %c0_i32_22 : i32
    scf.if %26 {
      %c0_23 = arith.constant 0 : index
      %c0_24 = arith.constant 0 : index
      %27 = vector.load %arg10[%c0_23, %c0_24] : memref<32x256xf32, #tpu.memory_space<vmem>>, vector<32x256xf32>
      %28 = arith.truncf %27 : vector<32x256xf32> to vector<32x256xbf16>
      %c0_25 = arith.constant 0 : index
      %c0_26 = arith.constant 0 : index
      %29 = vector.load %arg7[%c0_25, %c0_26] : memref<32x256xbf16, #tpu.memory_space<vmem>>, vector<32x256xbf16>
      tpu.vector_store %arg7[%c0_25, %c0_26], %28 {strides = array<i32>} : memref<32x256xbf16, #tpu.memory_space<vmem>>, vector<32x256xbf16>,
    } else {
    }
    return
  }
  func.func @transform_0(%arg0: i32, %arg1: i32, %arg2: i32) -> (i32, i32) {
    %c0_i32 = arith.constant 0 : i32
    return %arg0, %arg2 : i32, i32
  }
  func.func @transform_1(%arg0: i32, %arg1: i32, %arg2: i32) -> (i32, i32) {
    %c0_i32 = arith.constant 0 : i32
    return %arg2, %arg1 : i32, i32
  }
  func.func @transform_2(%arg0: i32, %arg1: i32, %arg2: i32) -> (i32, i32) {
    %c0_i32 = arith.constant 0 : i32
    return %arg2, %arg1 : i32, i32
  }
  func.func @transform_3(%arg0: i32, %arg1: i32, %arg2: i32) -> (i32, i32) {
    %c0_i32 = arith.constant 0 : i32
    %c0_i32_0 = arith.constant 0 : i32
    return %arg1, %c0_i32 : i32, i32
  }
  func.func @transform_4(%arg0: i32, %arg1: i32, %arg2: i32) -> (i32, i32) {
    %c0_i32 = arith.constant 0 : i32
    %c0_i32_0 = arith.constant 0 : i32
    return %arg0, %c0_i32 : i32, i32
  }
}

</mosaic_0001>

<bundles_post_ra>
// kernel: mlp_block_forward.1
= control target key start
LH: loop header
LB: loop body
LE: loop exit
PB: predicated region body
PF: predicated region fallthrough
CT: control target
= control target key end

     0   :  { %9 = vsyncpa [#allocation6], 0  ;;  %s1622_s0 = inlined_call_operand.vmem [shape: bf16[32,256], index: 0, kind: input, shape index: {}]   ;;  %s1623_s1 = inlined_call_operand.hbm [shape: bf16[256,256], index: 1, kind: input, shape index: {}]   ;;  %s1624_s2 = inlined_call_operand.hbm [shape: bf16[256,256], index: 2, kind: input, shape index: {}]   ;;  %s1625_s3 = inlined_call_operand.hbm [shape: bf16[256,256], index: 3, kind: input, shape index: {}]   ;;  %s1626_s4 = inlined_call_operand.hbm [shape: bf16[32,256], index: 4, kind: output, shape index: {}]  }
   0x1   :  { %10 = vsyncpa [#allocation9], 0 }
   0x2   :  { %11 = vsyncpa [#allocation7], 0  ;;  %s1480_s15 = smov [#allocation8]   ;;  %s1481_s17 = smov [#allocation5]  }
   0x3   :  { %s31_s16 = sshll.u32 %s1480_s15, 4  ;;  %s19_s18 = sshll.u32 %s1481_s17, 4  ;;  %s32_s16 = int_to_ptr.vmem [resolvable:$true] %s31_s16  ;;  %s1511_s18 = int_to_ptr.vmem [resolvable:$true] %s19_s18 }
   0x4   :  { %s1386_s21 = scalar_lea.hbm %s1624_s2, 4096 }
   0x5   :  { %p1387_p0 = scmp.ne.s32.totalorder %s1624_s2, %s1386_s21  ;;  %p1390_p1 = scmp.lt.u32.totalorder %s1386_s21, %s1624_s2 }
   0x7   :  { %p1392_p2 = pnand %p1390_p1, %p1387_p0 }
   0x9   :  { %1395 = shalt.err (!%p1392_p2)
}
   0xa   :  { %s1396_s26 = scalar_lea.vmem %s32_s16, 4096  ;;  %p1401_p4 = scmp.lt.s32.totalorder %s32_s16, %s32_s16 }
   0xb   :  { %p1397_p3 = scmp.ne.s32.totalorder %s32_s16, %s1396_s26  ;;  %p1402_p5 = scmp.lt.s32.totalorder %s1396_s26, %s1396_s26 }
   0xd   :  { %p1403_p6 = por %p1402_p5, %p1401_p4 }
   0xf   :  { %p1404_p7 = pnand %p1403_p6, %p1397_p3 }
  0x11   :  { %1407 = shalt.err (!%p1404_p7)
}
  0x12   :  { %s1482_s27 = smov 128   ;;  %s1483_s28 = smov 8  }
  0x13   :  { %37 = dma.hbm_to_vmem [thread:$0]  %s1624_s2, 4096, %s32_s16, [#allocation9], %s1482_s27, %s1482_s27, %s1483_s28  }
  0x14   :  { %s1408_s7 = scalar_lea.hbm %s1623_s1, 4096 }
  0x15   :  { %p1409_p8 = scmp.ne.s32.totalorder %s1623_s1, %s1408_s7  ;;  %p1412_p9 = scmp.lt.u32.totalorder %s1408_s7, %s1623_s1 }
  0x17   :  { %p1414_p10 = pnand %p1412_p9, %p1409_p8 }
  0x19   :  { %1417 = shalt.err (!%p1414_p10)
}
  0x1a   :  { %s1418_s12 = scalar_lea.vmem %s1511_s18, 4096  ;;  %p1423_p12 = scmp.lt.s32.totalorder %s1511_s18, %s1511_s18 }
  0x1b   :  { %p1419_p11 = scmp.ne.s32.totalorder %s1511_s18, %s1418_s12  ;;  %p1424_p13 = scmp.lt.s32.totalorder %s1418_s12, %s1418_s12 }
  0x1d   :  { %p1425_p0 = por %p1424_p13, %p1423_p12 }
  0x1f   :  { %p1426_p1 = pnand %p1425_p0, %p1419_p11 }
  0x21   :  { %1429 = shalt.err (!%p1426_p1)
}
  0x22   :  { %25 = dma.hbm_to_vmem [thread:$0]  %s1623_s1, 4096, %s1511_s18, [#allocation6], %s1482_s27, %s1482_s27, %s1483_s28  }
  0x23   :  { %s1484_s14 = smov [#allocation10]   ;;  %s1430_s19 = scalar_lea.hbm %s1625_s3, 4096 }
  0x24   :  { %s43_s15 = sshll.u32 %s1484_s14, 4  ;;  %p1431_p2 = scmp.ne.s32.totalorder %s1625_s3, %s1430_s19  ;;  %s44_s15 = int_to_ptr.vmem [resolvable:$true] %s43_s15 }
  0x25   :  { %p1434_p3 = scmp.lt.u32.totalorder %s1430_s19, %s1625_s3 }
  0x27   :  { %p1436_p4 = pnand %p1434_p3, %p1431_p2 }
  0x29   :  { %1439 = shalt.err (!%p1436_p4)
}
  0x2a   :  { %s1440_s24 = scalar_lea.vmem %s44_s15, 4096  ;;  %p1445_p6 = scmp.lt.s32.totalorder %s44_s15, %s44_s15 }
  0x2b   :  { %p1441_p5 = scmp.ne.s32.totalorder %s44_s15, %s1440_s24  ;;  %p1446_p7 = scmp.lt.s32.totalorder %s1440_s24, %s1440_s24 }
  0x2d   :  { %p1447_p8 = por %p1446_p7, %p1445_p6 }
  0x2f   :  { %p1448_p9 = pnand %p1447_p8, %p1441_p5 }
  0x31   :  { %1451 = shalt.err (!%p1448_p9)
}
  0x32   :  { %49 = dma.hbm_to_vmem [thread:$0]  %s1625_s3, 4096, %s44_s15, [#allocation9], %s1482_s27, %s1482_s27, %s1483_s28  }
  0x33   :  { %1474 = dma.done.wait [#allocation6], 4096  }
  0x34   :  { %1475 = vsyncadd [#allocation6], 4294963200 }
  0x35   :  { %1476 = dma.done.wait [#allocation9], 8192  }
  0x36   :  { %1477 = vsyncadd [#allocation9], 4294959104  ;;  %v1204_v0 = vld [vmem:[#allocation5 + $0x4] ss:$8 sps:$4 sm:$0xff]   ;;  %v1206_v1 = vld [vmem:[#allocation5] ss:$8 sps:$4 sm:$0xff]  }
  0x37   :  { %316 = vmatprep.subr.bf16.mxu0 %v1204_v0  ;;  %v1207_v2 = vld [vmem:[#allocation5 + $0x14] ss:$8 sps:$4 sm:$0xff]   ;;  %v1209_v3 = vld [vmem:[#allocation5 + $0x10] ss:$8 sps:$4 sm:$0xff]   ;;  %v1210_v4 = vld [vmem:[#allocation5 + $0x24] ss:$8 sps:$4 sm:$0xff]  }
  0x38   :  { %317 = vmatpush1.bf16.msra.mxu0 %v1206_v1  ;;  %v1212_v5 = vld [vmem:[#allocation5 + $0x20] ss:$8 sps:$4 sm:$0xff]   ;;  %v1213_v6 = vld [vmem:[#allocation5 + $0x34] ss:$8 sps:$4 sm:$0xff]   ;;  %v1225_v7 = vld [vmem:[#allocation8 + $0x4] ss:$8 sps:$4 sm:$0xff]  }
  0x39   :  { %318 = vmatprep.subr.bf16.mxu0 %v1207_v2  ;;  %v1215_v8 = vld [vmem:[#allocation5 + $0x30] ss:$8 sps:$4 sm:$0xff]   ;;  %v1216_v9 = vld [vmem:[#allocation5 + $0x44] ss:$8 sps:$4 sm:$0xff]   ;;  %v1229_v10 = vld [vmem:[#allocation8] ss:$8 sps:$4 sm:$0xff]   ;;  %585 = vmatprep.subr.bf16.mxu1 %v1225_v7 }
  0x3a   :  { %v1231_v11 = vld [vmem:[#allocation8 + $0x14] ss:$8 sps:$4 sm:$0xff]   ;;  %586 = vmatpush1.bf16.msra.mxu1 %v1229_v10  ;;  %v1218_v12 = vld [vmem:[#allocation5 + $0x40] ss:$8 sps:$4 sm:$0xff]   ;;  %v1235_v13 = vld [vmem:[#allocation8 + $0x10] ss:$8 sps:$4 sm:$0xff]  }
  0x3b   :  { %587 = vmatprep.subr.bf16.mxu1 %v1231_v11  ;;  %v1237_v14 = vld [vmem:[#allocation8 + $0x24] ss:$8 sps:$4 sm:$0xff]   ;;  %v1219_v15 = vld [vmem:[#allocation5 + $0x54] ss:$8 sps:$4 sm:$0xff]   ;;  %v1241_v16 = vld [vmem:[#allocation8 + $0x20] ss:$8 sps:$4 sm:$0xff]  }
  0x3c   :  { %319 = vmatpush1.bf16.msra.mxu0 %v1209_v3  ;;  %v1243_v17 = vld [vmem:[#allocation8 + $0x34] ss:$8 sps:$4 sm:$0xff]   ;;  %v1221_v18 = vld [vmem:[#allocation5 + $0x50] ss:$8 sps:$4 sm:$0xff]   ;;  %v1222_v19 = vld [vmem:[#allocation5 + $0x64] ss:$8 sps:$4 sm:$0xff]  }
  0x3d   :  { %320 = vmatprep.subr.bf16.mxu0 %v1210_v4  ;;  %v1247_v20 = vld [vmem:[#allocation8 + $0x30] ss:$8 sps:$4 sm:$0xff]   ;;  %v1249_v21 = vld [vmem:[#allocation8 + $0x44] ss:$8 sps:$4 sm:$0xff]   ;;  %v1224_v22 = vld [vmem:[#allocation5 + $0x60] ss:$8 sps:$4 sm:$0xff]  }
  0x3e   :  { %588 = vmatpush1.bf16.msra.mxu1 %v1235_v13  ;;  %v1227_v23 = vld [vmem:[#allocation5 + $0x74] ss:$8 sps:$4 sm:$0xff]   ;;  %v1253_v24 = vld [vmem:[#allocation8 + $0x40] ss:$8 sps:$4 sm:$0xff]   ;;  %v1230_v26 = vld [vmem:[#allocation5 + $0x70] ss:$8 sps:$4 sm:$0xff]  }
  0x3f   :  { %589 = vmatprep.subr.bf16.mxu1 %v1237_v14  ;;  %v1255_v25 = vld [vmem:[#allocation8 + $0x54] ss:$8 sps:$4 sm:$0xff]   ;;  %v1233_v27 = vld [vmem:[#allocation5 + $0x84] ss:$8 sps:$4 sm:$0xff]   ;;  %v1259_v28 = vld [vmem:[#allocation8 + $0x50] ss:$8 sps:$4 sm:$0xff]  }
  0x40   :  { %321 = vmatpush1.bf16.msra.mxu0 %v1212_v5  ;;  %v1261_v29 = vld [vmem:[#allocation8 + $0x64] ss:$8 sps:$4 sm:$0xff]   ;;  %v1236_v30 = vld [vmem:[#allocation5 + $0x80] ss:$8 sps:$4 sm:$0xff]   ;;  %v1239_v31 = vld [vmem:[#allocation5 + $0x94] ss:$8 sps:$4 sm:$0xff]  }
  0x41   :  { %322 = vmatprep.subr.bf16.mxu0 %v1213_v6  ;;  %v1265_v32 = vld [vmem:[#allocation8 + $0x60] ss:$8 sps:$4 sm:$0xff]   ;;  %v1267_v33 = vld [vmem:[#allocation8 + $0x74] ss:$8 sps:$4 sm:$0xff]   ;;  %v1281_v34 = vld [vmem:[%s1622_s0 + $0x4] ss:$8 sps:$4 sm:$0xff]  }
  0x42   :  { %590 = vmatpush1.bf16.msra.mxu1 %v1241_v16  ;;  %v1242_v35 = vld [vmem:[#allocation5 + $0x90] ss:$8 sps:$4 sm:$0xff]   ;;  %v1245_v36 = vld [vmem:[#allocation5 + $0xa4] ss:$8 sps:$4 sm:$0xff]   ;;  %348 = vmatprep.mubr.bf16.mxu0 %v1281_v34  ;;  %v1248_v39 = vld [vmem:[#allocation5 + $0xa0] ss:$8 sps:$4 sm:$0xff]  }
  0x43   :  { %591 = vmatprep.subr.bf16.mxu1 %v1243_v17  ;;  %v1271_v37 = vld [vmem:[#allocation8 + $0x70] ss:$8 sps:$4 sm:$0xff]   ;;  %617 = vmatprep.mubr.bf16.mxu1 %v1281_v34  ;;  %v1273_v38 = vld [vmem:[#allocation8 + $0x84] ss:$8 sps:$4 sm:$0xff]   ;;  %v1251_v40 = vld [vmem:[#allocation5 + $0xb4] ss:$8 sps:$4 sm:$0xff]  }
  0x44   :  { %323 = vmatpush1.bf16.msra.mxu0 %v1215_v8  ;;  %v1277_v41 = vld [vmem:[#allocation8 + $0x80] ss:$8 sps:$4 sm:$0xff]   ;;  %v1282_v42 = vld [vmem:[#allocation8 + $0x94] ss:$8 sps:$4 sm:$0xff]   ;;  %v1254_v43 = vld [vmem:[#allocation5 + $0xb0] ss:$8 sps:$4 sm:$0xff]  }
  0x45   :  { %324 = vmatprep.subr.bf16.mxu0 %v1216_v9  ;;  %v1257_v44 = vld [vmem:[#allocation5 + $0xc4] ss:$8 sps:$4 sm:$0xff]   ;;  %v1284_v45 = vld [vmem:[#allocation8 + $0x90] ss:$8 sps:$4 sm:$0xff]   ;;  %v1260_v47 = vld [vmem:[#allocation5 + $0xc0] ss:$8 sps:$4 sm:$0xff]  }
  0x46   :  { %592 = vmatpush1.bf16.msra.mxu1 %v1247_v20  ;;  %v1285_v46 = vld [vmem:[#allocation8 + $0xa4] ss:$8 sps:$4 sm:$0xff]   ;;  %v1263_v48 = vld [vmem:[#allocation5 + $0xd4] ss:$8 sps:$4 sm:$0xff]   ;;  %v1287_v49 = vld [vmem:[#allocation8 + $0xa0] ss:$8 sps:$4 sm:$0xff]  }
  0x47   :  { %593 = vmatprep.subr.bf16.mxu1 %v1249_v21  ;;  %v1290_v50 = vld [vmem:[#allocation8 + $0xb4] ss:$8 sps:$4 sm:$0xff]   ;;  %v1266_v51 = vld [vmem:[#allocation5 + $0xd0] ss:$8 sps:$4 sm:$0xff]   ;;  %v1269_v52 = vld [vmem:[#allocation5 + $0xe4] ss:$8 sps:$4 sm:$0xff]  }
  0x48   :  { %325 = vmatpush1.bf16.msra.mxu0 %v1218_v12  ;;  %v1272_v53 = vld [vmem:[#allocation5 + $0xe0] ss:$8 sps:$4 sm:$0xff]   ;;  %v1293_v54 = vld [vmem:[#allocation8 + $0xb0] ss:$8 sps:$4 sm:$0xff]   ;;  %v1275_v55 = vld [vmem:[#allocation5 + $0xf4] ss:$8 sps:$4 sm:$0xff]  }
  0x49   :  { %326 = vmatprep.subr.bf16.mxu0 %v1219_v15  ;;  %v1294_v56 = vld [vmem:[#allocation8 + $0xc4] ss:$8 sps:$4 sm:$0xff]   ;;  %v1296_v57 = vld [vmem:[#allocation8 + $0xc0] ss:$8 sps:$4 sm:$0xff]   ;;  %v1297_v58 = vld [vmem:[#allocation8 + $0xd4] ss:$8 sps:$4 sm:$0xff]  }
  0x4a   :  { %594 = vmatpush1.bf16.msra.mxu1 %v1253_v24  ;;  %v1278_v59 = vld [vmem:[#allocation5 + $0xf0] ss:$8 sps:$4 sm:$0xff]   ;;  %v1308_v60 = vld [vmem:[#allocation10 + $0x4] ss:$8 sps:$4 sm:$0xff]   ;;  %v1279_v62 = vld [vmem:[%s1622_s0] ss:$8 sps:$4 sm:$0xff]  }
  0x4b   :  { %595 = vmatprep.subr.bf16.mxu1 %v1255_v25  ;;  %v1299_v61 = vld [vmem:[#allocation8 + $0xd0] ss:$8 sps:$4 sm:$0xff]   ;;  %v1300_v63 = vld [vmem:[#allocation8 + $0xe4] ss:$8 sps:$4 sm:$0xff]   ;;  %v1288_v0 = vld [vmem:[%s1622_s0 + $0x14] ss:$8 sps:$4 sm:$0xff]  }
  0x4c   :  { %327 = vmatpush1.bf16.msra.mxu0 %v1221_v18  ;;  %v1306_v1 = vld [vmem:[#allocation10] ss:$8 sps:$4 sm:$0xff]   ;;  %v1311_v2 = vld [vmem:[#allocation10 + $0x14] ss:$8 sps:$4 sm:$0xff]   ;;  %v1309_v5 = vld [vmem:[#allocation10 + $0x10] ss:$8 sps:$4 sm:$0xff]  }
  0x4d   :  { %328 = vmatprep.subr.bf16.mxu0 %v1222_v19  ;;  %v1302_v3 = vld [vmem:[#allocation8 + $0xe0] ss:$8 sps:$4 sm:$0xff]   ;;  %v1303_v4 = vld [vmem:[#allocation8 + $0xf4] ss:$8 sps:$4 sm:$0xff]   ;;  %v1314_v6 = vld [vmem:[#allocation10 + $0x24] ss:$8 sps:$4 sm:$0xff]  }
  0x4e   :  { %596 = vmatpush1.bf16.msra.mxu1 %v1259_v28  ;;  %v1305_v7 = vld [vmem:[#allocation8 + $0xf0] ss:$8 sps:$4 sm:$0xff]   ;;  %v1312_v9 = vld [vmem:[#allocation10 + $0x20] ss:$8 sps:$4 sm:$0xff]   ;;  %v1317_v10 = vld [vmem:[#allocation10 + $0x34] ss:$8 sps:$4 sm:$0xff]  }
  0x4f   :  { %597 = vmatprep.subr.bf16.mxu1 %v1261_v29  ;;  %v1292_v8 = vld [vmem:[%s1622_s0 + $0x10] ss:$8 sps:$4 sm:$0xff]   ;;  %v1320_v12 = vld [vmem:[#allocation10 + $0x44] ss:$8 sps:$4 sm:$0xff]   ;;  %v1318_v13 = vld [vmem:[#allocation10 + $0x40] ss:$8 sps:$4 sm:$0xff]  }
  0x50   :  { %329 = vmatpush1.bf16.msra.mxu0 %v1224_v22  ;;  %v1315_v11 = vld [vmem:[#allocation10 + $0x30] ss:$8 sps:$4 sm:$0xff]   ;;  %v1323_v14 = vld [vmem:[#allocation10 + $0x54] ss:$8 sps:$4 sm:$0xff]   ;;  %v1326_v16 = vld [vmem:[#allocation10 + $0x64] ss:$8 sps:$4 sm:$0xff]  }
  0x51   :  { %330 = vmatprep.subr.bf16.mxu0 %v1227_v23  ;;  %v1321_v15 = vld [vmem:[#allocation10 + $0x50] ss:$8 sps:$4 sm:$0xff]   ;;  %v1324_v17 = vld [vmem:[#allocation10 + $0x60] ss:$8 sps:$4 sm:$0xff]   ;;  %v1329_v18 = vld [vmem:[#allocation10 + $0x74] ss:$8 sps:$4 sm:$0xff]  }
  0x52   :  { %598 = vmatpush1.bf16.msra.mxu1 %v1265_v32  ;;  %v1327_v19 = vld [vmem:[#allocation10 + $0x70] ss:$8 sps:$4 sm:$0xff]   ;;  %v1332_v20 = vld [vmem:[#allocation10 + $0x84] ss:$8 sps:$4 sm:$0xff]   ;;  %v1330_v21 = vld [vmem:[#allocation10 + $0x80] ss:$8 sps:$4 sm:$0xff]  }
  0x53   :  { %599 = vmatprep.subr.bf16.mxu1 %v1267_v33  ;;  %v1335_v22 = vld [vmem:[#allocation10 + $0x94] ss:$8 sps:$4 sm:$0xff]   ;;  %v1333_v23 = vld [vmem:[#allocation10 + $0x90] ss:$8 sps:$4 sm:$0xff]   ;;  %v1338_v24 = vld [vmem:[#allocation10 + $0xa4] ss:$8 sps:$4 sm:$0xff]  }
  0x54   :  { %331 = vmatpush1.bf16.msra.mxu0 %v1230_v26  ;;  %v1336_v25 = vld [vmem:[#allocation10 + $0xa0] ss:$8 sps:$4 sm:$0xff]   ;;  %v1341_v26 = vld [vmem:[#allocation10 + $0xb4] ss:$8 sps:$4 sm:$0xff]   ;;  %v1344_v28 = vld [vmem:[#allocation10 + $0xc4] ss:$8 sps:$4 sm:$0xff]  }
  0x55   :  { %332 = vmatprep.subr.bf16.mxu0 %v1233_v27  ;;  %v1339_v27 = vld [vmem:[#allocation10 + $0xb0] ss:$8 sps:$4 sm:$0xff]   ;;  %v1342_v29 = vld [vmem:[#allocation10 + $0xc0] ss:$8 sps:$4 sm:$0xff]   ;;  %v1350_v32 = vld [vmem:[#allocation10 + $0xe4] ss:$8 sps:$4 sm:$0xff]  }
  0x56   :  { %600 = vmatpush1.bf16.msra.mxu1 %v1271_v37  ;;  %v1348_v33 = vld [vmem:[#allocation10 + $0xe0] ss:$8 sps:$4 sm:$0xff]   ;;  %v1353_v34 = vld [vmem:[#allocation10 + $0xf4] ss:$8 sps:$4 sm:$0xff]   ;;  %s1485_s0 = smov [#allocation11]  }
  0x57   :  { %601 = vmatprep.subr.bf16.mxu1 %v1273_v38  ;;  %s1045_s8 = sshll.u32 %s1485_s0, 4  ;;  %s1046_s8 = int_to_ptr.vmem [resolvable:$true] %s1045_s8 }
  0x58   :  { %333 = vmatpush1.bf16.msra.mxu0 %v1236_v30  ;;  %v1347_v30 = vld [vmem:[#allocation10 + $0xd4] ss:$8 sps:$4 sm:$0xff]   ;;  %s1452_s9 = scalar_lea.vmem %s1046_s8, 512  ;;  %p1457_p11 = scmp.lt.s32.totalorder %s1046_s8, %s1046_s8 }
  0x59   :  { %334 = vmatprep.subr.bf16.mxu0 %v1239_v31  ;;  %v1345_v31 = vld [vmem:[#allocation10 + $0xd0] ss:$8 sps:$4 sm:$0xff]   ;;  %p1453_p10 = scmp.ne.s32.totalorder %s1046_s8, %s1452_s9  ;;  %p1458_p12 = scmp.lt.s32.totalorder %s1452_s9, %s1452_s9 }
  0x5a   :  { %602 = vmatpush1.bf16.msra.mxu1 %v1277_v41 }
  0x5b   :  { %603 = vmatprep.subr.bf16.mxu1 %v1282_v42  ;;  %p1459_p13 = por %p1458_p12, %p1457_p11 }
  0x5c   :  { %335 = vmatpush1.bf16.msra.mxu0 %v1242_v35  ;;  %v1351_v35 = vld [vmem:[#allocation10 + $0xf0] ss:$8 sps:$4 sm:$0xff]  }
  0x5d   :  { %336 = vmatprep.subr.bf16.mxu0 %v1245_v36  ;;  %p1460_p0 = pnand %p1459_p13, %p1453_p10 }
  0x5e   :  { %604 = vmatpush1.bf16.msra.mxu1 %v1284_v45 }
  0x5f   :  { %605 = vmatprep.subr.bf16.mxu1 %v1285_v46 }
  0x60   :  { %337 = vmatpush1.bf16.msra.mxu0 %v1248_v39 }
  0x61   :  { %338 = vmatprep.subr.bf16.mxu0 %v1251_v40 }
  0x62   :  { %606 = vmatpush1.bf16.msra.mxu1 %v1287_v49 }
  0x63   :  { %607 = vmatprep.subr.bf16.mxu1 %v1290_v50 }
  0x64   :  { %339 = vmatpush1.bf16.msra.mxu0 %v1254_v43 }
  0x65   :  { %340 = vmatprep.subr.bf16.mxu0 %v1257_v44 }
  0x66   :  { %608 = vmatpush1.bf16.msra.mxu1 %v1293_v54 }
  0x67   :  { %609 = vmatprep.subr.bf16.mxu1 %v1294_v56 }
  0x68   :  { %341 = vmatpush1.bf16.msra.mxu0 %v1260_v47 }
  0x69   :  { %342 = vmatprep.subr.bf16.mxu0 %v1263_v48 }
  0x6a   :  { %610 = vmatpush1.bf16.msra.mxu1 %v1296_v57 }
  0x6b   :  { %611 = vmatprep.subr.bf16.mxu1 %v1297_v58 }
  0x6c   :  { %343 = vmatpush1.bf16.msra.mxu0 %v1266_v51 }
  0x6d   :  { %344 = vmatprep.subr.bf16.mxu0 %v1269_v52 }
  0x6e   :  { %612 = vmatpush1.bf16.msra.mxu1 %v1299_v61 }
  0x6f   :  { %613 = vmatprep.subr.bf16.mxu1 %v1300_v63 }
  0x70   :  { %345 = vmatpush1.bf16.msra.mxu0 %v1272_v53 }
  0x71   :  { %346 = vmatprep.subr.bf16.mxu0 %v1275_v55 }
  0x72   :  { %614 = vmatpush1.bf16.msra.mxu1 %v1302_v3 }
  0x73   :  { %615 = vmatprep.subr.bf16.mxu1 %v1303_v4 }
  0x74   :  { %347 = vmatpush1.bf16.msra.mxu0 %v1278_v59 }
  0x75   :  { %933 = vmatprep.subr.bf16.mxu0 %v1308_v60 }
  0x76   :  { %616 = vmatpush1.bf16.msra.mxu1 %v1305_v7 }
  0x77   :  { %349 = vmatmul.mubr.bf16.vlgmr.msra.gmra.mrb[0].mxu0 %v1279_v62  ;;  %1166 = vmatprep.subr.bf16.mxu1 %v1308_v60 }
  0x78   :  { %358 = vmatprep.mubr.bf16.mxu0 %v1288_v0  ;;  %934 = vmatpush1.bf16.msra.mxu0 %v1306_v1 }
  0x79   :  { %935 = vmatprep.subr.bf16.mxu0 %v1311_v2  ;;  %618 = vmatmul.mubr.bf16.vlgmr.msra.gmra.mrb[0].mxu1 %v1279_v62 }
  0x7a   :  { %627 = vmatprep.mubr.bf16.mxu1 %v1288_v0  ;;  %1182 = vmatpush1.bf16.msra.mxu1 %v1306_v1 }
  0x7b   :  { %1167 = vmatprep.subr.bf16.mxu1 %v1311_v2 }
  0x7c   :  { %936 = vmatpush1.bf16.msra.mxu0 %v1309_v5 }
  0x7d   :  { %937 = vmatprep.subr.bf16.mxu0 %v1314_v6 }
  0x7e   :  { %1183 = vmatpush1.bf16.msra.mxu1 %v1309_v5 }
  0x7f   :  { %359 = vmatmul.mubr.bf16.gmra.mrb[4].mxu0 %v1292_v8  ;;  %1168 = vmatprep.subr.bf16.mxu1 %v1314_v6 }
  0x80   :  { %938 = vmatpush1.bf16.msra.mxu0 %v1312_v9 }
  0x81   :  { %939 = vmatprep.subr.bf16.mxu0 %v1317_v10  ;;  %628 = vmatmul.mubr.bf16.gmra.mrb[4].mxu1 %v1292_v8 }
  0x82   :  { %1184 = vmatpush1.bf16.msra.mxu1 %v1312_v9 }
  0x83   :  { %1169 = vmatprep.subr.bf16.mxu1 %v1317_v10 }
  0x84   :  { %940 = vmatpush1.bf16.msra.mxu0 %v1315_v11 }
  0x85   :  { %941 = vmatprep.subr.bf16.mxu0 %v1320_v12 }
  0x86   :  { %1185 = vmatpush1.bf16.msra.mxu1 %v1315_v11 }
  0x87   :  { %1170 = vmatprep.subr.bf16.mxu1 %v1320_v12 }
  0x88   :  { %942 = vmatpush1.bf16.msra.mxu0 %v1318_v13 }
  0x89   :  { %943 = vmatprep.subr.bf16.mxu0 %v1323_v14 }
  0x8a   :  { %1186 = vmatpush1.bf16.msra.mxu1 %v1318_v13 }
  0x8b   :  { %1171 = vmatprep.subr.bf16.mxu1 %v1323_v14 }
  0x8c   :  { %944 = vmatpush1.bf16.msra.mxu0 %v1321_v15 }
  0x8d   :  { %945 = vmatprep.subr.bf16.mxu0 %v1326_v16 }
  0x8e   :  { %1187 = vmatpush1.bf16.msra.mxu1 %v1321_v15 }
  0x8f   :  { %1172 = vmatprep.subr.bf16.mxu1 %v1326_v16 }
  0x90   :  { %946 = vmatpush1.bf16.msra.mxu0 %v1324_v17 }
  0x91   :  { %947 = vmatprep.subr.bf16.mxu0 %v1329_v18 }
  0x92   :  { %1188 = vmatpush1.bf16.msra.mxu1 %v1324_v17 }
  0x93   :  { %1173 = vmatprep.subr.bf16.mxu1 %v1329_v18 }
  0x94   :  { %948 = vmatpush1.bf16.msra.mxu0 %v1327_v19 }
  0x95   :  { %949 = vmatprep.subr.bf16.mxu0 %v1332_v20 }
  0x96   :  { %1189 = vmatpush1.bf16.msra.mxu1 %v1327_v19 }
  0x97   :  { %1174 = vmatprep.subr.bf16.mxu1 %v1332_v20 }
  0x98   :  { %950 = vmatpush1.bf16.msra.mxu0 %v1330_v21 }
  0x99   :  { %951 = vmatprep.subr.bf16.mxu0 %v1335_v22 }
  0x9a   :  { %1190 = vmatpush1.bf16.msra.mxu1 %v1330_v21 }
  0x9b   :  { %1175 = vmatprep.subr.bf16.mxu1 %v1335_v22 }
  0x9c   :  { %952 = vmatpush1.bf16.msra.mxu0 %v1333_v23 }
  0x9d   :  { %953 = vmatprep.subr.bf16.mxu0 %v1338_v24 }
  0x9e   :  { %1191 = vmatpush1.bf16.msra.mxu1 %v1333_v23 }
  0x9f   :  { %1176 = vmatprep.subr.bf16.mxu1 %v1338_v24 }
  0xa0   :  { %954 = vmatpush1.bf16.msra.mxu0 %v1336_v25 }
  0xa1   :  { %955 = vmatprep.subr.bf16.mxu0 %v1341_v26 }
  0xa2   :  { %1192 = vmatpush1.bf16.msra.mxu1 %v1336_v25 }
  0xa3   :  { %1177 = vmatprep.subr.bf16.mxu1 %v1341_v26 }
  0xa4   :  { %956 = vmatpush1.bf16.msra.mxu0 %v1339_v27 }
  0xa5   :  { %957 = vmatprep.subr.bf16.mxu0 %v1344_v28 }
  0xa6   :  { %1193 = vmatpush1.bf16.msra.mxu1 %v1339_v27 }
  0xa7   :  { %1178 = vmatprep.subr.bf16.mxu1 %v1344_v28 }
  0xa8   :  { %958 = vmatpush1.bf16.msra.mxu0 %v1342_v29 }
  0xa9   :  { %959 = vmatprep.subr.bf16.mxu0 %v1347_v30 }
  0xaa   :  { %1194 = vmatpush1.bf16.msra.mxu1 %v1342_v29 }
  0xab   :  { %1179 = vmatprep.subr.bf16.mxu1 %v1347_v30 }
  0xac   :  { %960 = vmatpush1.bf16.msra.mxu0 %v1345_v31 }
  0xad   :  { %961 = vmatprep.subr.bf16.mxu0 %v1350_v32 }
  0xae   :  { %1195 = vmatpush1.bf16.msra.mxu1 %v1345_v31 }
  0xaf   :  { %1180 = vmatprep.subr.bf16.mxu1 %v1350_v32 }
  0xb0   :  { %962 = vmatpush1.bf16.msra.mxu0 %v1348_v33 }
  0xb1   :  { %963 = vmatprep.subr.bf16.mxu0 %v1353_v34 }
  0xb2   :  { %1196 = vmatpush1.bf16.msra.mxu1 %v1348_v33 }
  0xb3   :  { %1181 = vmatprep.subr.bf16.mxu1 %v1353_v34 }
  0xb4   :  { %964 = vmatpush1.bf16.msra.mxu0 %v1351_v35 }
  0xb6   :  { %1197 = vmatpush1.bf16.msra.mxu1 %v1351_v35 }
 0x14a   :  { %v1575_v36 = vpop.f32.mrb[0].mxu0 }
 0x14b   :  { %v673_v37 = vsub.f32 0.0, %v1575_v36  ;;  %v1578_v38 = vpop.f32.mrb[1].mxu0 }
 0x14c   :  { %v674_v39 = vsub.f32 0.0, %v1578_v38  ;;  %v1581_v40 = vpop.f32.mrb[2].mxu0  ;;  %v619_v53 = vpop.f32.mrb[0].mxu1 }
 0x14d   :  { %v681_v41 = vmul.f32 1.442695, %v673_v37  ;;  %v675_v42 = vsub.f32 0.0, %v1581_v40  ;;  %v1584_v43 = vpop.f32.mrb[3].mxu0  ;;  %v621_v57 = vpop.f32.mrb[1].mxu1 }
 0x14e   :  { %v683_v44 = vmul.f32 1.442695, %v674_v39  ;;  %v676_v45 = vsub.f32 0.0, %v1584_v43  ;;  %v623_v60 = vpop.f32.mrb[2].mxu1 }
 0x14f   :  { %1354 = vpow2.f32 %v681_v41  ;;  %v685_v46 = vmul.f32 1.442695, %v675_v42  ;;  %v625_v62 = vpop.f32.mrb[3].mxu1 }
 0x150   :  { %1356 = vpow2.f32 %v683_v44  ;;  %v687_v47 = vmul.f32 1.442695, %v676_v45 }
 0x151   :  { %1358 = vpow2.f32 %v685_v46 }
 0x152   :  { %1360 = vpow2.f32 %v687_v47  ;;  %v1587_v48 = vpop.f32.mrb[4].mxu0 }
 0x153   :  { %v677_v49 = vsub.f32 0.0, %v1587_v48  ;;  %v1590_v50 = vpop.f32.mrb[5].mxu0 }
 0x154   :  { %v678_v51 = vsub.f32 0.0, %v1590_v50  ;;  %v1593_v52 = vpop.f32.mrb[6].mxu0  ;;  %v629_v7 = vpop.f32.mrb[4].mxu1 }
 0x155   :  { %v689_v54 = vmul.f32 1.442695, %v677_v49  ;;  %v679_v55 = vsub.f32 0.0, %v1593_v52  ;;  %v1596_v56 = vpop.f32.mrb[7].mxu0  ;;  %v631_v9 = vpop.f32.mrb[5].mxu1 }
 0x156   :  { %v691_v58 = vmul.f32 1.442695, %v678_v51  ;;  %v680_v59 = vsub.f32 0.0, %v1596_v56  ;;  %v633_v10 = vpop.f32.mrb[6].mxu1 }
 0x157   :  { %1362 = vpow2.f32 %v689_v54  ;;  %v693_v61 = vmul.f32 1.442695, %v679_v55  ;;  %v635_v11 = vpop.f32.mrb[7].mxu1 }
 0x158   :  { %1364 = vpow2.f32 %v691_v58  ;;  %v695_v63 = vmul.f32 1.442695, %v680_v59 }
 0x159   :  { %v1355_v0 = vpop.eup %1354  ;;  %1366 = vpow2.f32 %v693_v61 }
 0x15a   :  { %v1357_v1 = vpop.eup %1356  ;;  %v697_v2 = vadd.f32 1.0, %v1355_v0  ;;  %1368 = vpow2.f32 %v695_v63 }
 0x15b   :  { %v1359_v3 = vpop.eup %1358  ;;  %v698_v4 = vadd.f32 1.0, %v1357_v1 }
 0x15c   :  { %v1361_v5 = vpop.eup %1360  ;;  %1370 = vrcp.f32 %v697_v2  ;;  %v699_v6 = vadd.f32 1.0, %v1359_v3 }
 0x15d   :  { %1372 = vrcp.f32 %v698_v4  ;;  %v700_v8 = vadd.f32 1.0, %v1361_v5 }
 0x15e   :  { %1374 = vrcp.f32 %v699_v6 }
 0x15f   :  { %1376 = vrcp.f32 %v700_v8 }
 0x161   :  { %v1363_v12 = vpop.eup %1362 }
 0x162   :  { %v1365_v13 = vpop.eup %1364  ;;  %v701_v14 = vadd.f32 1.0, %v1363_v12 }
 0x163   :  { %v1367_v15 = vpop.eup %1366  ;;  %v702_v16 = vadd.f32 1.0, %v1365_v13 }
 0x164   :  { %v1369_v17 = vpop.eup %1368  ;;  %1378 = vrcp.f32 %v701_v14  ;;  %v703_v18 = vadd.f32 1.0, %v1367_v15 }
 0x165   :  { %1380 = vrcp.f32 %v702_v16  ;;  %v704_v19 = vadd.f32 1.0, %v1369_v17 }
 0x166   :  { %v1371_v20 = vpop.eup %1370  ;;  %1382 = vrcp.f32 %v703_v18 }
 0x167   :  { %v1373_v21 = vpop.eup %1372  ;;  %v713_v22 = vmul.f32 %v1371_v20, %v1575_v36  ;;  %1384 = vrcp.f32 %v704_v19 }
 0x168   :  { %v1375_v23 = vpop.eup %1374  ;;  %v714_v24 = vmul.f32 %v1373_v21, %v1578_v38 }
 0x169   :  { %v1377_v25 = vpop.eup %1376  ;;  %v715_v26 = vmul.f32 %v1375_v23, %v1581_v40  ;;  %v721_v27 = vmul.f32 %v713_v22, %v619_v53 }
 0x16a   :  { %v716_v28 = vmul.f32 %v1377_v25, %v1584_v43  ;;  %v722_v29 = vmul.f32 %v714_v24, %v621_v57 }
 0x16b   :  { %v723_v30 = vmul.f32 %v715_v26, %v623_v60 }
 0x16c   :  { %v724_v31 = vmul.f32 %v716_v28, %v625_v62 }
 0x16d   :  { %v729_v32 = vpack.c.bf16 %v723_v30, %v721_v27 }
 0x16e   :  { %v1379_v33 = vpop.eup %1378  ;;  %v730_v34 = vpack.c.bf16 %v724_v31, %v722_v29 }
 0x16f   :  { %v1381_v35 = vpop.eup %1380  ;;  %v717_v37 = vmul.f32 %v1379_v33, %v1587_v48 }
 0x170   :  { %v1383_v36 = vpop.eup %1382  ;;  %v718_v39 = vmul.f32 %v1381_v35, %v1590_v50  ;;  %965 = vmatprep.mubr.bf16.mxu0 %v730_v34 }
 0x171   :  { %v1385_v38 = vpop.eup %1384  ;;  %v719_v41 = vmul.f32 %v1383_v36, %v1593_v52  ;;  %v725_v40 = vmul.f32 %v717_v37, %v629_v7  ;;  %966 = vmatmul.mubr.bf16.vlgmr.msra.gmra.mrb[8].mxu0 %v729_v32 }
 0x172   :  { %v720_v42 = vmul.f32 %v1385_v38, %v1596_v56  ;;  %v726_v43 = vmul.f32 %v718_v39, %v631_v9 }
 0x173   :  { %v727_v44 = vmul.f32 %v719_v41, %v633_v10 }
 0x174   :  { %v728_v45 = vmul.f32 %v720_v42, %v635_v11 }
 0x175   :  { %v731_v46 = vpack.c.bf16 %v727_v44, %v725_v40 }
 0x176   :  { %v732_v47 = vpack.c.bf16 %v728_v45, %v726_v43 }
 0x178   :  { %975 = vmatprep.mubr.bf16.mxu1 %v732_v47 }
 0x179   :  { %976 = vmatmul.mubr.bf16.vlgmr.msra.gmra.mrb[8].mxu1 %v731_v46 }
 0x244   :  { %v967_v49 = vpop.f32.mrb[8].mxu0 }
 0x245   :  { %v969_v48 = vpop.f32.mrb[9].mxu0 }
 0x246   :  { %v1162_v51 = vpack.c.bf16 %v969_v48, %v967_v49  ;;  %v971_v53 = vpop.f32.mrb[10].mxu0 }
 0x247   :  { %v973_v50 = vpop.f32.mrb[11].mxu0 }
 0x248   :  { %1036 = vst [vmem:[#allocation11] sm:$0xff] %v1162_v51  ;;  %v1163_v54 = vpack.c.bf16 %v973_v50, %v971_v53 }
 0x24a   :  { %1037 = vst [vmem:[#allocation11 + $0x8] sm:$0xff] %v1163_v54 }
 0x24c   :  { %v977_v52 = vpop.f32.mrb[8].mxu1 }
 0x24d   :  { %v979_v55 = vpop.f32.mrb[9].mxu1 }
 0x24e   :  { %v1164_v56 = vpack.c.bf16 %v979_v55, %v977_v52  ;;  %v981_v57 = vpop.f32.mrb[10].mxu1 }
 0x24f   :  { %v983_v58 = vpop.f32.mrb[11].mxu1 }
 0x250   :  { %1038 = vst [vmem:[#allocation11 + $0x10] sm:$0xff] %v1164_v56  ;;  %v1165_v59 = vpack.c.bf16 %v983_v58, %v981_v57 }
 0x252   :  { %1039 = vst [vmem:[#allocation11 + $0x18] sm:$0xff] %v1165_v59 }
 0x253   :  { %1463 = shalt.err (!%p1460_p0)
}
 0x254   :  { %s1464_s12 = scalar_lea.hbm %s1626_s4, 512 }
 0x255   :  { %p1465_p1 = scmp.ne.s32.totalorder %s1626_s4, %s1464_s12  ;;  %p1468_p2 = scmp.lt.u32.totalorder %s1464_s12, %s1626_s4 }
 0x257   :  { %p1470_p3 = pnand %p1468_p2, %p1465_p1 }
 0x259   :  { %1473 = shalt.err (!%p1470_p3)
}
 0x25a   :  { %1051 = dma.vmem_to_hbm [thread:$0]  %s1046_s8, 512, %s1626_s4, [#allocation7], %s1482_s27, %s1482_s27, %s1483_s28  }
 0x25b   :  { %1478 = dma.done.wait [#allocation7], 512  }
 0x25c   :  { %1479 = vsyncadd [#allocation7], 4294966784 }
 0x25d   :  { %1055 = vsyncpa [#allocation6], 1 }
 0x25e   :  { %1056 = vsyncpa [#allocation9], 1 }
 0x25f   :  { %1057 = vsyncpa [#allocation7], 1 }

</bundles_post_ra>
